<compile_context>
chip_gen: v7x
topology: tpu7x:2x2x1
jax: 0.10.0
libtpu: 0.0.40
codegen_flags: <defaults>
</compile_context>

<pallas_src>
import functools
import math

import jax
import jax.numpy as jnp
from jax import lax
from jax.experimental import pallas as pl
from jax.experimental.pallas import tpu as pltpu

LANE = 128         # lane width (last dim of every VMEM tile)
SUBLANE_F32 = 8    # f32 sublane packing -> batch tile must be a multiple of 8


def _round_up(x, m):
    return (x + m - 1) // m * m


def logreg_kernel(x_ref, we_ref, be_ref, wc_ref, bc_ref, out_ref):
    """One batch tile: out = relu(x @ We.T + be) @ Wc.T + bc.

    x arrives f32 straight from HBM (no wrapper cast/pad pass); the bf16 cast happens
    here on the VPU just before the MXU.  Weights are in torch (out, in) layout and
    dot_general contracts on axis 1 of both operands, so no transpose is materialized.
    torch.no_grad() -> forward only.
    """
    x = x_ref[...].astype(jnp.bfloat16)                 # in-kernel cast (VPU, cheap vs DMA)

    # ---- stand-in simCLR encoder: h = relu(x @ W_enc.T + b_enc) ----
    h = lax.dot_general(
        x, we_ref[...],
        dimension_numbers=(((1,), (1,)), ((), ())),
        preferred_element_type=jnp.float32)             # (bn, F_pad) f32 accumulator
    h = jnp.maximum(h + be_ref[...], 0.0)               # f32 epilogue (bias + ReLU)

    # ---- classifier head: nn.Linear(n_features, n_classes): y = h @ W_cls.T + b ----
    y = lax.dot_general(
        h.astype(wc_ref.dtype), wc_ref[...],            # bf16 operands, f32 accumulate
        dimension_numbers=(((1,), (1,)), ((), ())),
        preferred_element_type=jnp.float32)             # (bn, C_pad) f32
    out_ref[...] = y + bc_ref[...]                      # lane-dense (128-wide) store


def prepare_params(W_enc, b_enc, W_cls, b_cls):
    """One-time weight prep (cache the result alongside the module params).

    Pads only the feature / class dims to lane-dense multiples of 128 with zeros and
    casts matmul operands to bf16.  K (the encoder input dim) is deliberately NOT
    padded so the per-call x can be passed unpadded.  Padded rows/columns are zero,
    so the sliced logits are identical in meaning to the unpadded math.
    """
    F, K = W_enc.shape
    C, F2 = W_cls.shape
    assert F2 == F
    F_pad = _round_up(F, LANE)
    C_pad = _round_up(C, LANE)
    We = jnp.zeros((F_pad, K), jnp.bfloat16).at[:F, :].set(W_enc.astype(jnp.bfloat16))
    Wc = jnp.zeros((C_pad, F_pad), jnp.bfloat16).at[:C, :F].set(W_cls.astype(jnp.bfloat16))
    be = jnp.zeros((1, F_pad), jnp.float32).at[0, :F].set(b_enc.astype(jnp.float32))
    bc = jnp.zeros((1, C_pad), jnp.float32).at[0, :C].set(b_cls.astype(jnp.float32))
    return We, be, Wc, bc


@functools.partial(jax.jit, static_argnames=("n_classes", "batch_tile"))
def logistic_regression_forward(x_nchw, We, be, Wc, bc, *, n_classes, batch_tile=None):
    """x_nchw: [N, C, H, W].  We/be/Wc/bc from prepare_params.
    Returns logits [N, n_classes] float32."""
    N = x_nchw.shape[0]
    K = math.prod(x_nchw.shape[1:])
    F_pad, K_w = We.shape
    C_pad = Wc.shape[0]
    if K_w != K:
        raise ValueError(f"encoder weight K={K_w} does not match flattened input K={K}")

    # Batch tile: multiple of 8 (f32 sublane), >= 2 grid steps whenever N allows
    # (keeps both v7x TensorCores busy), capped at 1024 rows (f32 x tile + f32 out
    # tile, double buffered ~9 MiB at K=1024 -> inside v5e's 16 MiB scoped default;
    # raise vmem_limit_bytes before pushing the cap further).
    if batch_tile is not None:
        if batch_tile % SUBLANE_F32 != 0:
            raise ValueError("batch_tile must be a multiple of 8 (f32 sublane tiling)")
        bn = batch_tile
    else:
        bn = min(1024, max(SUBLANE_F32, _round_up(pl.cdiv(N, 2), SUBLANE_F32)))

    grid_n = pl.cdiv(N, bn)
    N_pad = grid_n * bn

    # x stays f32 and is only reshaped (free for contiguous NCHW): no cast pass, no
    # full-array zero-pad pass.  The bf16 cast happens in-kernel.
    x_flat = x_nchw.reshape(N, K)
    if N_pad != N:
        # Ragged batch only: pad tail rows with zeros so the grid divides evenly.
        # Zero rows give garbage-free padded logits that are sliced away below.
        # This branch is a no-op (zero extra HBM traffic) when N % bn == 0.
        x_flat = jnp.pad(x_flat, ((0, N_pad - N), (0, 0)))

    out = pl.pallas_call(
        logreg_kernel,
        out_shape=jax.ShapeDtypeStruct((N_pad, C_pad), jnp.float32),
        grid_spec=pltpu.PrefetchScalarGridSpec(
            num_scalar_prefetch=0,
            grid=(grid_n,),
            in_specs=[
                pl.BlockSpec((bn, K), lambda i: (i, 0)),        # x tile   (pipelined, f32)
                pl.BlockSpec((F_pad, K), lambda i: (0, 0)),     # W_enc    (VMEM-resident)
                pl.BlockSpec((1, F_pad), lambda i: (0, 0)),     # b_enc    (resident)
                pl.BlockSpec((C_pad, F_pad), lambda i: (0, 0)), # W_cls    (resident)
                pl.BlockSpec((1, C_pad), lambda i: (0, 0)),     # b_cls    (resident)
            ],
            out_specs=pl.BlockSpec((bn, C_pad), lambda i: (i, 0)),  # lane-dense output
        ),
        compiler_params=pltpu.CompilerParams(
            # Batch tiles are independent -> shard across v7x's 2 TCs; no-op on v5e/v6e.
            dimension_semantics=("parallel",),
        ),
    )(x_flat, We, be, Wc, bc)

    return out[:N, :n_classes]


if __name__ == "__main__":
    # Small shapes consistent with the module: NCHW image batch.
    N, C, H, W = 2, 4, 16, 16
    n_features = 64      # simCLR.n_features
    n_classes = 10

    key = jax.random.PRNGKey(0)
    kx, k1, k2, k3, k4 = jax.random.split(key, 5)

    x = jax.random.normal(kx, (N, C, H, W), dtype=jnp.float32)

    in_dim = C * H * W
    # Deterministic parameter init (synthetic; no checkpoint loading).
    W_enc = jax.random.normal(k1, (n_features, in_dim), dtype=jnp.float32) * 0.02
    b_enc = jax.random.normal(k2, (n_features,), dtype=jnp.float32) * 0.01
    W_cls = jax.random.normal(k3, (n_classes, n_features), dtype=jnp.float32) * 0.05
    b_cls = jax.random.normal(k4, (n_classes,), dtype=jnp.float32) * 0.01

    # One-time weight prep (would be cached alongside the module params).
    We, be, Wc, bc = prepare_params(W_enc, b_enc, W_cls, b_cls)

    out = logistic_regression_forward(x, We, be, Wc, bc, n_classes=n_classes)
    out = jax.block_until_ready(out)

    # Reference check in plain JAX f32 (same math as the torch module w/ stand-in encoder).
    h_ref = jnp.maximum(x.reshape(N, -1) @ W_enc.T + b_enc, 0.0)
    ref = h_ref @ W_cls.T + b_cls
    assert out.shape == (N, n_classes)
    # bf16 matmul operands with f32 accumulation: relaxed tolerance vs the f32 reference.
    assert jnp.allclose(out, ref, atol=5e-2, rtol=5e-2), float(jnp.max(jnp.abs(out - ref)))

    print("KERNEL_OK")
</pallas_src>

<mosaic_0001>
module attributes {stable_mosaic.version = 11 : i64} {
  func.func @logreg_kernel(%arg0: i32, %arg1: memref<8x1024xf32, #tpu.memory_space<vmem>>, %arg2: memref<128x1024xbf16, #tpu.memory_space<vmem>>, %arg3: memref<1x128xf32, #tpu.memory_space<vmem>>, %arg4: memref<128x128xbf16, #tpu.memory_space<vmem>>, %arg5: memref<1x128xf32, #tpu.memory_space<vmem>>, %arg6: memref<8x128xf32, #tpu.memory_space<vmem>>) attributes {dimension_semantics = [#tpu.dimension_semantics<parallel>], iteration_bounds = array<i64: 1>, scalar_prefetch = 0 : i64, scratch_operands = 0 : i64, tpu.core_type = #tpu.core_type<tc>, window_params = [{transform_indices = @transform_0, window_bounds = array<i64: 8, 1024>}, {pipeline_mode = #tpu.pipeline_mode<synchronous>, transform_indices = @transform_1, window_bounds = array<i64: 128, 1024>}, {pipeline_mode = #tpu.pipeline_mode<synchronous>, transform_indices = @transform_2, window_bounds = array<i64: 1, 128>}, {pipeline_mode = #tpu.pipeline_mode<synchronous>, transform_indices = @transform_3, window_bounds = array<i64: 128, 128>}, {pipeline_mode = #tpu.pipeline_mode<synchronous>, transform_indices = @transform_4, window_bounds = array<i64: 1, 128>}, {transform_indices = @transform_5, window_bounds = array<i64: 8, 128>}]} {
    %c0 = arith.constant 0 : index
    %c0_0 = arith.constant 0 : index
    %0 = vector.load %arg1[%c0, %c0_0] : memref<8x1024xf32, #tpu.memory_space<vmem>>, vector<8x1024xf32>
    %1 = arith.truncf %0 : vector<8x1024xf32> to vector<8x1024xbf16>
    %c0_1 = arith.constant 0 : index
    %c0_2 = arith.constant 0 : index
    %2 = vector.load %arg2[%c0_1, %c0_2] : memref<128x1024xbf16, #tpu.memory_space<vmem>>, vector<128x1024xbf16>
    %cst = arith.constant dense<0.000000e+00> : vector<8x128xf32>
    %3 = tpu.matmul %1, %2, %cst {dimension_numbers = #tpu.dot_dimension_numbers<[1], [1], [0], [0], [0, 0, 1, 0], [], []>} : vector<8x1024xbf16>, vector<128x1024xbf16>, vector<8x128xf32> -> vector<8x128xf32>
    %c0_3 = arith.constant 0 : index
    %c0_4 = arith.constant 0 : index
    %4 = vector.load %arg3[%c0_3, %c0_4] : memref<1x128xf32, #tpu.memory_space<vmem>>, vector<1x128xf32>
    %5 = vector.broadcast %4 : vector<1x128xf32> to vector<8x128xf32>
    %6 = arith.addf %3, %5 : vector<8x128xf32>
    %cst_5 = arith.constant 0.000000e+00 : f32
    %7 = vector.broadcast %cst_5 : f32 to vector<8x128xf32>
    %8 = arith.maximumf %6, %7 : vector<8x128xf32>
    %9 = arith.truncf %8 : vector<8x128xf32> to vector<8x128xbf16>
    %c0_6 = arith.constant 0 : index
    %c0_7 = arith.constant 0 : index
    %10 = vector.load %arg4[%c0_6, %c0_7] : memref<128x128xbf16, #tpu.memory_space<vmem>>, vector<128x128xbf16>
    %cst_8 = arith.constant dense<0.000000e+00> : vector<8x128xf32>
    %11 = tpu.matmul %9, %10, %cst_8 {dimension_numbers = #tpu.dot_dimension_numbers<[1], [1], [0], [0], [0, 0, 1, 0], [], []>} : vector<8x128xbf16>, vector<128x128xbf16>, vector<8x128xf32> -> vector<8x128xf32>
    %c0_9 = arith.constant 0 : index
    %c0_10 = arith.constant 0 : index
    %12 = vector.load %arg5[%c0_9, %c0_10] : memref<1x128xf32, #tpu.memory_space<vmem>>, vector<1x128xf32>
    %13 = vector.broadcast %12 : vector<1x128xf32> to vector<8x128xf32>
    %14 = arith.addf %11, %13 : vector<8x128xf32>
    %c0_11 = arith.constant 0 : index
    %c0_12 = arith.constant 0 : index
    %15 = vector.load %arg6[%c0_11, %c0_12] : memref<8x128xf32, #tpu.memory_space<vmem>>, vector<8x128xf32>
    tpu.vector_store %arg6[%c0_11, %c0_12], %14 {strides = array<i32>} : memref<8x128xf32, #tpu.memory_space<vmem>>, vector<8x128xf32>,
    return
  }
  func.func @transform_0(%arg0: i32) -> (i32, i32) {
    %c0_i32 = arith.constant 0 : i32
    %c0_i32_0 = arith.constant 0 : i32
    return %arg0, %c0_i32 : i32, i32
  }
  func.func @transform_1(%arg0: i32) -> (i32, i32) {
    %c0_i32 = arith.constant 0 : i32
    %c0_i32_0 = arith.constant 0 : i32
    %c0_i32_1 = arith.constant 0 : i32
    return %c0_i32, %c0_i32_0 : i32, i32
  }
  func.func @transform_2(%arg0: i32) -> (i32, i32) {
    %c0_i32 = arith.constant 0 : i32
    %c0_i32_0 = arith.constant 0 : i32
    %c0_i32_1 = arith.constant 0 : i32
    return %c0_i32, %c0_i32_0 : i32, i32
  }
  func.func @transform_3(%arg0: i32) -> (i32, i32) {
    %c0_i32 = arith.constant 0 : i32
    %c0_i32_0 = arith.constant 0 : i32
    %c0_i32_1 = arith.constant 0 : i32
    return %c0_i32, %c0_i32_0 : i32, i32
  }
  func.func @transform_4(%arg0: i32) -> (i32, i32) {
    %c0_i32 = arith.constant 0 : i32
    %c0_i32_0 = arith.constant 0 : i32
    %c0_i32_1 = arith.constant 0 : i32
    return %c0_i32, %c0_i32_0 : i32, i32
  }
  func.func @transform_5(%arg0: i32) -> (i32, i32) {
    %c0_i32 = arith.constant 0 : i32
    %c0_i32_0 = arith.constant 0 : i32
    return %arg0, %c0_i32 : i32, i32
  }
}

</mosaic_0001>

<bundles_post_ra>
// kernel: logistic_regression_forward.1
= control target key start
LH: loop header
LB: loop body
LE: loop exit
PB: predicated region body
PF: predicated region fallthrough
CT: control target
= control target key end

     0   :  { %10 = vsyncpa [#allocation3], 0  ;;  %s871_s18 = smov [#allocation2]   ;;  %s984_s0 = inlined_call_operand.vmem [shape: f32[8,1024], index: 0, kind: input, shape index: {}]   ;;  %s985_s1 = inlined_call_operand.hbm [shape: bf16[128,1024], index: 1, kind: input, shape index: {}]   ;;  %s986_s2 = inlined_call_operand.vmem [shape: f32[1,128], index: 2, kind: input, shape index: {}]   ;;  %s987_s3 = inlined_call_operand.vmem [shape: bf16[128,128], index: 3, kind: input, shape index: {}]   ;;  %s988_s4 = inlined_call_operand.vmem [shape: f32[1,128], index: 4, kind: input, shape index: {}]   ;;  %s989_s5 = inlined_call_operand.vmem [shape: f32[8,128], index: 5, kind: output, shape index: {}]  }
   0x1   :  { %s18_s19 = sshll.u32 %s871_s18, 4  ;;  %s847_s22 = scalar_lea.hbm %s985_s1, 8192  ;;  %s19_s19 = int_to_ptr.vmem [resolvable:$true] %s18_s19 }
   0x2   :  { %p848_p0 = scmp.ne.s32.totalorder %s985_s1, %s847_s22  ;;  %p851_p1 = scmp.lt.u32.totalorder %s847_s22, %s985_s1 }
   0x4   :  { %p853_p2 = pnand %p851_p1, %p848_p0 }
   0x6   :  { %856 = shalt.err (!%p853_p2)
}
   0x7   :  { %s857_s27 = scalar_lea.vmem %s19_s19, 8192  ;;  %p862_p4 = scmp.lt.s32.totalorder %s19_s19, %s19_s19 }
   0x8   :  { %p858_p3 = scmp.ne.s32.totalorder %s19_s19, %s857_s27  ;;  %p863_p5 = scmp.lt.s32.totalorder %s857_s27, %s857_s27 }
   0xa   :  { %p864_p6 = por %p863_p5, %p862_p4 }
   0xc   :  { %p865_p7 = pnand %p864_p6, %p858_p3 }
   0xe   :  { %868 = shalt.err (!%p865_p7)
}
   0xf   :  { %s872_s28 = smov 512   ;;  %s873_s29 = smov 32  }
  0x10   :  { %24 = dma.hbm_to_vmem [thread:$0]  %s985_s1, 8192, %s19_s19, [#allocation3], %s872_s28, %s872_s28, %s873_s29  }
  0x11   :  { %869 = dma.done.wait [#allocation3], 8192  }
  0x12   :  { %870 = vsyncadd [#allocation3], 4294959104  ;;  %v52_v0 = vld [vmem:[#allocation2 + $0x8] sm:$0xff]  ;;  %v38_v7 = vld [vmem:[%s984_s0 + $0x18] sm:$0xff]  ;;  %vm875_vm0 = vmmov 0  }
  0x13   :  { %v56_v1 = vld [vmem:[#allocation2 + $0x28] sm:$0xff]  ;;  %v46_v10 = vpack.c.bf16 %v38_v7, %v38_v7  ;;  %v51_v13 = vld [vmem:[#allocation2] sm:$0xff]  ;;  %v53_v60 = vld [vmem:[#allocation2 + $0x10] sm:$0xff] }
  0x14   :  { %v60_v2 = vld [vmem:[#allocation2 + $0x48] sm:$0xff]  ;;  %v725_v3 = vcombine.high %v52_v0, %v56_v1  ;;  %v724_v4 = vcombine.low %v52_v0, %v56_v1  ;;  %v55_v14 = vld [vmem:[#allocation2 + $0x20] sm:$0xff]  ;;  %v57_v61 = vld [vmem:[#allocation2 + $0x30] sm:$0xff] }
  0x15   :  { %v64_v5 = vld [vmem:[#allocation2 + $0x68] sm:$0xff]  ;;  %514 = vmatprep.mubr.bf16.mxu0 %v46_v10  ;;  %v723_v15 = vcombine.high %v51_v13, %v55_v14  ;;  %v722_v16 = vcombine.low %v51_v13, %v55_v14  ;;  %v59_v17 = vld [vmem:[#allocation2 + $0x40] sm:$0xff]  ;;  %v727_v63 = vcombine.high %v53_v60, %v57_v61 }
  0x16   :  { %v733_v6 = vcombine.high %v60_v2, %v64_v5  ;;  %482 = vmatprep.subr.bf16.mxu0 %v725_v3  ;;  %v68_v8 = vld [vmem:[#allocation2 + $0x88] sm:$0xff]  ;;  %v732_v11 = vcombine.low %v60_v2, %v64_v5  ;;  %v63_v18 = vld [vmem:[#allocation2 + $0x60] sm:$0xff]  ;;  %v37_v5 = vld [vmem:[%s984_s0 + $0x10] sm:$0xff] }
  0x17   :  { %483 = vmatpush1.bf16.xpose.msra.mxu0 %v724_v4  ;;  %v72_v9 = vld [vmem:[#allocation2 + $0xa8] sm:$0xff]  ;;  %442 = vmatprep.subr.bf16.mxu1 %v723_v15  ;;  %v731_v21 = vcombine.high %v59_v17, %v63_v18  ;;  %v67_v22 = vld [vmem:[#allocation2 + $0x80] sm:$0xff]  ;;  %v730_v26 = vcombine.low %v59_v17, %v63_v18  ;;  %v45_v10 = vpack.c.bf16 %v37_v5, %v37_v5  ;;  %v69_v15 = vld [vmem:[#allocation2 + $0x90] sm:$0xff] }
  0x18   :  { %484 = vmatprep.subr.bf16.mxu0 %v733_v6  ;;  %v741_v12 = vcombine.high %v68_v8, %v72_v9  ;;  %v76_v19 = vld [vmem:[#allocation2 + $0xc8] sm:$0xff]  ;;  %443 = vmatpush1.bf16.xpose.msra.mxu1 %v722_v16  ;;  %v71_v23 = vld [vmem:[#allocation2 + $0xa0] sm:$0xff]  ;;  %v740_v24 = vcombine.low %v68_v8, %v72_v9  ;;  %v61_v8 = vld [vmem:[#allocation2 + $0x50] sm:$0xff] }
  0x19   :  { %v80_v20 = vld [vmem:[#allocation2 + $0xe8] sm:$0xff]  ;;  %444 = vmatprep.subr.bf16.mxu1 %v731_v21  ;;  %v739_v28 = vcombine.high %v67_v22, %v71_v23  ;;  %v75_v32 = vld [vmem:[#allocation2 + $0xc0] sm:$0xff]  ;;  %v738_v34 = vcombine.low %v67_v22, %v71_v23  ;;  %v65_v9 = vld [vmem:[#allocation2 + $0x70] sm:$0xff] }
  0x1a   :  { %v749_v25 = vcombine.high %v76_v19, %v80_v20  ;;  %v84_v27 = vld [vmem:[#allocation2 + $0x108] sm:$0xff]  ;;  %v748_v30 = vcombine.low %v76_v19, %v80_v20  ;;  %v79_v33 = vld [vmem:[#allocation2 + $0xe0] sm:$0xff]  ;;  %v735_v13 = vcombine.high %v61_v8, %v65_v9  ;;  %v73_v16 = vld [vmem:[#allocation2 + $0xb0] sm:$0xff]  ;;  %v734_v18 = vcombine.low %v61_v8, %v65_v9 }
  0x1b   :  { %v88_v29 = vld [vmem:[#allocation2 + $0x128] sm:$0xff]  ;;  %v747_v35 = vcombine.high %v75_v32, %v79_v33  ;;  %v83_v40 = vld [vmem:[#allocation2 + $0x100] sm:$0xff]  ;;  %v746_v42 = vcombine.low %v75_v32, %v79_v33  ;;  %v874_v19 = vmov 0.0   ;;  %v743_v20 = vcombine.high %v69_v15, %v73_v16  ;;  %v77_v23 = vld [vmem:[#allocation2 + $0xd0] sm:$0xff] }
  0x1c   :  { %v757_v31 = vcombine.high %v84_v27, %v88_v29  ;;  %v92_v36 = vld [vmem:[#allocation2 + $0x148] sm:$0xff]  ;;  %v756_v38 = vcombine.low %v84_v27, %v88_v29  ;;  %v87_v41 = vld [vmem:[#allocation2 + $0x120] sm:$0xff]  ;;  %v89_v29 = vld [vmem:[#allocation2 + $0x130] sm:$0xff] }
  0x1d   :  { %v96_v37 = vld [vmem:[#allocation2 + $0x168] sm:$0xff]  ;;  %v755_v43 = vcombine.high %v83_v40, %v87_v41  ;;  %v91_v48 = vld [vmem:[#allocation2 + $0x140] sm:$0xff]  ;;  %v754_v50 = vcombine.low %v83_v40, %v87_v41  ;;  %v841_v32 = vld [vmem:[%s987_s3 + $0x10] sm:$0xff]  }
  0x1e   :  { %v765_v39 = vcombine.high %v92_v36, %v96_v37  ;;  %v100_v44 = vld [vmem:[#allocation2 + $0x188] sm:$0xff]  ;;  %v764_v46 = vcombine.low %v92_v36, %v96_v37  ;;  %v95_v49 = vld [vmem:[#allocation2 + $0x160] sm:$0xff]  ;;  %v93_v33 = vld [vmem:[#allocation2 + $0x150] sm:$0xff] }
  0x1f   :  { %485 = vmatpush1.bf16.xpose.msra.mxu0 %v732_v11  ;;  %v104_v45 = vld [vmem:[#allocation2 + $0x1a8] sm:$0xff]  ;;  %v763_v51 = vcombine.high %v91_v48, %v95_v49  ;;  %v99_v56 = vld [vmem:[#allocation2 + $0x180] sm:$0xff]  ;;  %v762_v58 = vcombine.low %v91_v48, %v95_v49  ;;  %v726_v11 = vcombine.low %v53_v60, %v57_v61  ;;  %v842_v37 = vld [vmem:[%s987_s3 + $0x18] sm:$0xff]  }
  0x20   :  { %486 = vmatprep.subr.bf16.mxu0 %v741_v12  ;;  %445 = vmatpush1.bf16.xpose.msra.mxu1 %v730_v26  ;;  %v773_v47 = vcombine.high %v100_v44, %v104_v45  ;;  %v108_v52 = vld [vmem:[#allocation2 + $0x1c8] sm:$0xff]  ;;  %v772_v54 = vcombine.low %v100_v44, %v104_v45  ;;  %v103_v57 = vld [vmem:[#allocation2 + $0x1a0] sm:$0xff]  ;;  %v113_v44 = vld [vmem:[#allocation2 + $0x1f0] sm:$0xff] }
  0x21   :  { %446 = vmatprep.subr.bf16.mxu1 %v739_v28  ;;  %v112_v53 = vld [vmem:[#allocation2 + $0x1e8] sm:$0xff]  ;;  %v771_v59 = vcombine.high %v99_v56, %v103_v57  ;;  %v107_v0 = vld [vmem:[#allocation2 + $0x1c0] sm:$0xff]  ;;  %v770_v3 = vcombine.low %v99_v56, %v103_v57  ;;  %v85_v28 = vld [vmem:[#allocation2 + $0x110] sm:$0xff] }
  0x22   :  { %v781_v55 = vcombine.high %v108_v52, %v112_v53  ;;  %v780_v62 = vcombine.low %v108_v52, %v112_v53  ;;  %v111_v1 = vld [vmem:[#allocation2 + $0x1e0] sm:$0xff]  ;;  %v36_v2 = vld [vmem:[%s984_s0 + $0x8] sm:$0xff]  ;;  %v54_v48 = vld [vmem:[#allocation2 + $0x18] sm:$0xff] }
  0x23   :  { %v44_v4 = vpack.c.bf16 %v36_v2, %v36_v2  ;;  %v779_v6 = vcombine.high %v107_v0, %v111_v1  ;;  %v40_v7 = vld [vmem:[%s984_s0 + $0x28] sm:$0xff]  ;;  %v778_v14 = vcombine.low %v107_v0, %v111_v1  ;;  %v35_v17 = vld [vmem:[%s984_s0] sm:$0xff]  ;;  %v58_v49 = vld [vmem:[#allocation2 + $0x38] sm:$0xff] }
  0x24   :  { %v48_v12 = vpack.c.bf16 %v40_v7, %v40_v7  ;;  %v43_v21 = vpack.c.bf16 %v35_v17, %v35_v17  ;;  %v839_v22 = vld [vmem:[%s987_s3] sm:$0xff]   ;;  %v840_v27 = vld [vmem:[%s987_s3 + $0x8] sm:$0xff]   ;;  %v845_v52 = vld [vmem:[%s987_s3 + $0x30] sm:$0xff]  }
  0x25   :  { %474 = vmatprep.mubr.bf16.mxu1 %v44_v4  ;;  %v39_v53 = vld [vmem:[%s984_s0 + $0x20] sm:$0xff]  ;;  %v66_v56 = vld [vmem:[#allocation2 + $0x78] sm:$0xff] }
  0x26   :  { %v47_v57 = vpack.c.bf16 %v39_v53, %v39_v53  ;;  %v70_v61 = vld [vmem:[#allocation2 + $0x98] sm:$0xff] }
  0x27   :  { %487 = vmatpush1.bf16.xpose.msra.mxu0 %v740_v24  ;;  %v81_v24 = vld [vmem:[#allocation2 + $0xf0] sm:$0xff]  ;;  %v78_v1 = vld [vmem:[#allocation2 + $0xd8] sm:$0xff] }
  0x28   :  { %488 = vmatprep.subr.bf16.mxu0 %v749_v25  ;;  %447 = vmatpush1.bf16.xpose.msra.mxu1 %v738_v34  ;;  %v742_v25 = vcombine.low %v69_v15, %v73_v16  ;;  %v751_v26 = vcombine.high %v77_v23, %v81_v24  ;;  %v97_v34 = vld [vmem:[#allocation2 + $0x170] sm:$0xff]  ;;  %v82_v2 = vld [vmem:[#allocation2 + $0xf8] sm:$0xff] }
  0x29   :  { %448 = vmatprep.subr.bf16.mxu1 %v747_v35  ;;  %v758_v35 = vcombine.low %v85_v28, %v89_v29  ;;  %v767_v36 = vcombine.high %v93_v33, %v97_v34  ;;  %v766_v40 = vcombine.low %v93_v33, %v97_v34  ;;  %v753_v4 = vcombine.high %v78_v1, %v82_v2  ;;  %v86_v5 = vld [vmem:[#allocation2 + $0x118] sm:$0xff] }
  0x2a   :  { %v752_v7 = vcombine.low %v78_v1, %v82_v2  ;;  %v94_v9 = vld [vmem:[#allocation2 + $0x158] sm:$0xff] }
  0x2b   :  { %v110_v17 = vld [vmem:[#allocation2 + $0x1d8] sm:$0xff] }
  0x2f   :  { %489 = vmatpush1.bf16.xpose.msra.mxu0 %v748_v30  ;;  %v750_v30 = vcombine.low %v77_v23, %v81_v24  ;;  %v41_v23 = vld [vmem:[%s984_s0 + $0x30] sm:$0xff] }
  0x30   :  { %490 = vmatprep.subr.bf16.mxu0 %v757_v31  ;;  %449 = vmatpush1.bf16.xpose.msra.mxu1 %v746_v42  ;;  %v759_v31 = vcombine.high %v85_v28, %v89_v29  ;;  %v843_v42 = vld [vmem:[%s987_s3 + $0x20] sm:$0xff]   ;;  %v49_v24 = vpack.c.bf16 %v41_v23, %v41_v23 }
  0x31   :  { %450 = vmatprep.subr.bf16.mxu1 %v755_v43  ;;  %v109_v43 = vld [vmem:[#allocation2 + $0x1d0] sm:$0xff] }
  0x37   :  { %491 = vmatpush1.bf16.xpose.msra.mxu0 %v756_v38  ;;  %v101_v38 = vld [vmem:[#allocation2 + $0x190] sm:$0xff] }
  0x38   :  { %492 = vmatprep.subr.bf16.mxu0 %v765_v39  ;;  %451 = vmatpush1.bf16.xpose.msra.mxu1 %v754_v50  ;;  %v105_v39 = vld [vmem:[#allocation2 + $0x1b0] sm:$0xff]  ;;  %v782_v50 = vcombine.low %v109_v43, %v113_v44 }
  0x39   :  { %452 = vmatprep.subr.bf16.mxu1 %v763_v51  ;;  %v775_v41 = vcombine.high %v101_v38, %v105_v39  ;;  %v774_v45 = vcombine.low %v101_v38, %v105_v39  ;;  %v729_v51 = vcombine.high %v54_v48, %v58_v49 }
  0x3f   :  { %493 = vmatpush1.bf16.xpose.msra.mxu0 %v764_v46  ;;  %v783_v46 = vcombine.high %v109_v43, %v113_v44 }
  0x40   :  { %494 = vmatprep.subr.bf16.mxu0 %v773_v47  ;;  %453 = vmatpush1.bf16.xpose.msra.mxu1 %v762_v58  ;;  %v844_v47 = vld [vmem:[%s987_s3 + $0x28] sm:$0xff]   ;;  %v728_v58 = vcombine.low %v54_v48, %v58_v49 }
  0x41   :  { %454 = vmatprep.subr.bf16.mxu1 %v771_v59 }
  0x47   :  { %495 = vmatpush1.bf16.xpose.msra.mxu0 %v772_v54  ;;  %v42_v54 = vld [vmem:[%s984_s0 + $0x38] sm:$0xff] }
  0x48   :  { %496 = vmatprep.subr.bf16.mxu0 %v781_v55  ;;  %455 = vmatpush1.bf16.xpose.msra.mxu1 %v770_v3  ;;  %v62_v55 = vld [vmem:[#allocation2 + $0x58] sm:$0xff]  ;;  %v50_v59 = vpack.c.bf16 %v42_v54, %v42_v54 }
  0x49   :  { %456 = vmatprep.subr.bf16.mxu1 %v779_v6  ;;  %v737_v60 = vcombine.high %v62_v55, %v66_v56  ;;  %v90_v6 = vld [vmem:[#allocation2 + $0x138] sm:$0xff] }
  0x4a   :  { %v761_v8 = vcombine.high %v86_v5, %v90_v6 }
  0x4f   :  { %497 = vmatpush1.bf16.xpose.msra.mxu0 %v780_v62  ;;  %v74_v62 = vld [vmem:[#allocation2 + $0xb8] sm:$0xff] }
  0x50   :  { %522 = vmatprep.subr.bf16.mxu0 %v727_v63  ;;  %457 = vmatpush1.bf16.xpose.msra.mxu1 %v778_v14  ;;  %v736_v63 = vcombine.low %v62_v55, %v66_v56  ;;  %v745_v0 = vcombine.high %v70_v61, %v74_v62  ;;  %v744_v3 = vcombine.low %v70_v61, %v74_v62  ;;  %v106_v14 = vld [vmem:[#allocation2 + $0x1b8] sm:$0xff] }
  0x51   :  { %804 = vmatprep.subr.bf16.mxu1 %v874_v19 }
  0x56   :  { %515 = vmatmul.mubr.bf16.vlgmr.msra.gmra.mrb[0].mxu0 %v45_v10  ;;  %v98_v10 = vld [vmem:[#allocation2 + $0x178] sm:$0xff] }
  0x57   :  { %523 = vmatpush1.bf16.xpose.msra.mxu0 %v726_v11  ;;  %554 = vmatprep.mubr.bf16.mxu0 %v48_v12  ;;  %v760_v11 = vcombine.low %v86_v5, %v90_v6  ;;  %v769_v12 = vcombine.high %v94_v9, %v98_v10  ;;  %v768_v15 = vcombine.low %v94_v9, %v98_v10 }
  0x58   :  { %524 = vmatprep.subr.bf16.mxu0 %v735_v13  ;;  %475 = vmatmul.mubr.bf16.vlgmr.msra.gmra.mrb[0].mxu1 %v43_v21  ;;  %v102_v13 = vld [vmem:[#allocation2 + $0x198] sm:$0xff] }
  0x59   :  { %805 = vmatpush3.bf16.xpose.msra.mxu1 %v839_v22  ;;  %v777_v16 = vcombine.high %v102_v13, %v106_v14  ;;  %820 = vmatprep.mubr.msk.bf16.mxu1 %vm875_vm0, %v874_v19 }
  0x5a   :  { %806 = vmatprep.subr.bf16.mxu1 %v874_v19 }
  0x5f   :  { %525 = vmatpush1.bf16.xpose.msra.mxu0 %v734_v18  ;;  %v114_v18 = vld [vmem:[#allocation2 + $0x1f8] sm:$0xff] }
  0x60   :  { %526 = vmatprep.subr.bf16.mxu0 %v743_v20  ;;  %v776_v20 = vcombine.low %v102_v13, %v106_v14  ;;  %v785_v21 = vcombine.high %v110_v17, %v114_v18  ;;  %v784_v22 = vcombine.low %v110_v17, %v114_v18 }
  0x61   :  { %807 = vmatpush3.bf16.xpose.msra.mxu1 %v840_v27 }
  0x62   :  { %808 = vmatprep.subr.bf16.mxu1 %v874_v19 }
  0x67   :  { %527 = vmatpush1.bf16.xpose.msra.mxu0 %v742_v25  ;;  %v846_v25 = vld [vmem:[%s987_s3 + $0x38] sm:$0xff]  }
  0x68   :  { %528 = vmatprep.subr.bf16.mxu0 %v751_v26 }
  0x69   :  { %809 = vmatpush3.bf16.xpose.msra.mxu1 %v841_v32 }
  0x6a   :  { %810 = vmatprep.subr.bf16.mxu1 %v874_v19 }
  0x6f   :  { %529 = vmatpush1.bf16.xpose.msra.mxu0 %v750_v30  ;;  %v721_v30 = vld [vmem:[%s986_s2] ss:$0 sm:$0xff] }
  0x70   :  { %530 = vmatprep.subr.bf16.mxu0 %v759_v31 }
  0x71   :  { %811 = vmatpush3.bf16.xpose.msra.mxu1 %v842_v37 }
  0x72   :  { %812 = vmatprep.subr.bf16.mxu1 %v874_v19 }
  0x77   :  { %531 = vmatpush1.bf16.xpose.msra.mxu0 %v758_v35 }
  0x78   :  { %532 = vmatprep.subr.bf16.mxu0 %v767_v36 }
  0x79   :  { %813 = vmatpush3.bf16.xpose.msra.mxu1 %v843_v42 }
  0x7a   :  { %814 = vmatprep.subr.bf16.mxu1 %v874_v19 }
  0x7f   :  { %533 = vmatpush1.bf16.xpose.msra.mxu0 %v766_v40 }
  0x80   :  { %534 = vmatprep.subr.bf16.mxu0 %v775_v41 }
  0x81   :  { %815 = vmatpush3.bf16.xpose.msra.mxu1 %v844_v47 }
  0x82   :  { %816 = vmatprep.subr.bf16.mxu1 %v874_v19 }
  0x87   :  { %535 = vmatpush1.bf16.xpose.msra.mxu0 %v774_v45 }
  0x88   :  { %536 = vmatprep.subr.bf16.mxu0 %v783_v46 }
  0x89   :  { %817 = vmatpush3.bf16.xpose.msra.mxu1 %v845_v52 }
  0x8a   :  { %818 = vmatprep.subr.bf16.mxu1 %v874_v19  ;;  %v786_v19 = vld [vmem:[%s988_s4] ss:$0 sm:$0xff] }
  0x8f   :  { %537 = vmatpush1.bf16.xpose.msra.mxu0 %v782_v50 }
  0x90   :  { %562 = vmatprep.subr.bf16.mxu0 %v729_v51 }
  0x91   :  { %819 = vmatpush3.bf16.xpose.msra.mxu1 %v846_v25 }
  0x96   :  { %555 = vmatmul.mubr.bf16.vlgmr.msra.gmra.mrb[0].mxu0 %v47_v57 }
  0x97   :  { %563 = vmatpush1.bf16.xpose.msra.mxu0 %v728_v58  ;;  %594 = vmatprep.mubr.bf16.mxu0 %v50_v59 }
  0x98   :  { %564 = vmatprep.subr.bf16.mxu0 %v737_v60 }
  0x9f   :  { %565 = vmatpush1.bf16.xpose.msra.mxu0 %v736_v63 }
  0xa0   :  { %566 = vmatprep.subr.bf16.mxu0 %v745_v0 }
  0xa7   :  { %567 = vmatpush1.bf16.xpose.msra.mxu0 %v744_v3 }
  0xa8   :  { %568 = vmatprep.subr.bf16.mxu0 %v753_v4 }
  0xaf   :  { %569 = vmatpush1.bf16.xpose.msra.mxu0 %v752_v7 }
  0xb0   :  { %570 = vmatprep.subr.bf16.mxu0 %v761_v8 }
  0xb7   :  { %571 = vmatpush1.bf16.xpose.msra.mxu0 %v760_v11 }
  0xb8   :  { %572 = vmatprep.subr.bf16.mxu0 %v769_v12 }
  0xbf   :  { %573 = vmatpush1.bf16.xpose.msra.mxu0 %v768_v15 }
  0xc0   :  { %574 = vmatprep.subr.bf16.mxu0 %v777_v16 }
  0xc7   :  { %575 = vmatpush1.bf16.xpose.msra.mxu0 %v776_v20 }
  0xc8   :  { %576 = vmatprep.subr.bf16.mxu0 %v785_v21 }
  0xcf   :  { %577 = vmatpush1.bf16.xpose.msra.mxu0 %v784_v22 }
  0xd6   :  { %595 = vmatmul.mubr.bf16.vlgmr.msra.gmra.mrb[0].mxu0 %v49_v24 }
 0x12b   :  { %v476_v26 = vpop.f32.mrb[0].mxu1 }
 0x12c   :  { %v478_v27 = vpop.f32.mrb[1].mxu1  ;;  %v477_v31 = vadd.f32 %v721_v30, %v476_v26 }
 0x12d   :  { %v479_v28 = vpop.f32.mrb[2].mxu1 }
 0x12e   :  { %v480_v29 = vpop.f32.mrb[3].mxu1 }
 0x1a9   :  { %v596_v32 = vpop.f32.mrb[0].mxu0 }
 0x1aa   :  { %v825_v33 = vadd.f32 %v596_v32, %v477_v31  ;;  %v598_v34 = vpop.f32.mrb[1].mxu0 }
 0x1ab   :  { %v599_v35 = vpop.f32.mrb[2].mxu0 }
 0x1ac   :  { %v602_v36 = vmax.f32 %v825_v33, 0.0  ;;  %v600_v37 = vpop.f32.mrb[3].mxu0 }
 0x1ae   :  { %v603_v38 = vpack.c.bf16 %v602_v36, %v602_v36 }
 0x1b0   :  { %821 = vmatmul.mubr.bf16.vlgmr.msra.gmra.mrb[4].mxu1 %v603_v38 }
 0x283   :  { %v709_v39 = vpop.f32.mrb[4].mxu1 }
 0x284   :  { %v710_v40 = vadd.f32 %v786_v19, %v709_v39  ;;  %v822_v41 = vpop.f32.mrb[5].mxu1 }
 0x285   :  { %v712_v42 = vpop.f32.mrb[6].mxu1 }
 0x286   :  { %715 = vst [vmem:[%s989_s5] sm:$0xff] %v710_v40  ;;  %v823_v43 = vpop.f32.mrb[7].mxu1 }
 0x287   :  { %720 = vsyncpa [#allocation3], 1 }

</bundles_post_ra>
